<compile_context>
chip_gen: v6e
topology: v6e:2x2x1
jax: 0.10.0
libtpu: 0.0.40
codegen_flags: <defaults>
</compile_context>

<pallas_src>
import functools

import jax
import jax.numpy as jnp
from jax import lax
from jax.experimental import pallas as pl
from jax.experimental.pallas import tpu as pltpu

_LANES = 128
_UNROLL_COL_TILES = 8      # static unroll of the 128-col chunk loop up to this


def _cdiv(a, b):
    return (a + b - 1) // b


def _round_down(x, m):
    return (x // m) * m


def _round_up(x, m):
    return _cdiv(x, m) * m


def _tversky_partial_sums_kernel(
        pred_ref, targ_ref, tp_ref, sp_ref, st_ref, *,
        hw, tile_hw, cols_per_split, col_blocks, need_mask, has_overhang,
        apply_sigmoid):
    """Accumulate per-(n*c)-row lane partials of sum(p*t), sum(p), sum(t)."""
    s = pl.program_id(0)                  # spatial split (parallel; v7x megacore)
    k = pl.program_id(2)                  # spatial reduction step (arbitrary)
    block_idx = s * cols_per_split + k    # global column-block index
    tr = tp_ref.shape[0]

    @pl.when(k == 0)
    def _():
        zeros = jnp.zeros(tp_ref.shape, jnp.float32)
        tp_ref[...] = zeros
        sp_ref[...] = zeros
        st_ref[...] = zeros

    def load_chunk(col_slice, limit):
        """Load a column chunk as f32 (+ sigmoid); mask columns >= limit."""
        p = pred_ref[:, col_slice].astype(jnp.float32)
        if apply_sigmoid:
            # sigmoid(x) = 0.5*tanh(0.5*x) + 0.5 : one EUP tanh + 2 VALU ops;
            # keeps the transcendental off the VALU (exact, numerically stable).
            p = 0.5 * jnp.tanh(0.5 * p) + 0.5
        t = targ_ref[:, col_slice].astype(jnp.float32)
        if limit is not None:
            col = lax.broadcasted_iota(jnp.int32, p.shape, 1)
            valid = col < limit
            p = jnp.where(valid, p, 0.0)
            t = jnp.where(valid, t, 0.0)
        return p, t

    k_tiles = tile_hw // _LANES if tile_hw % _LANES == 0 else 0

    def accumulate(masked):
        if k_tiles == 0:
            # hw not 128-aligned (single full-width block, tiny spatial dims):
            # XLU row-reduce into lane 0 of the accumulators.
            p, t = load_chunk(slice(None), None)
            tp_ref[:, 0:1] += jnp.sum(p * t, axis=-1, keepdims=True)
            sp_ref[:, 0:1] += jnp.sum(p, axis=-1, keepdims=True)
            st_ref[:, 0:1] += jnp.sum(t, axis=-1, keepdims=True)
            return

        block_col0 = block_idx * tile_hw if masked else None

        if k_tiles <= _UNROLL_COL_TILES:
            a_tp = jnp.zeros((tr, _LANES), jnp.float32)
            a_sp = jnp.zeros((tr, _LANES), jnp.float32)
            a_st = jnp.zeros((tr, _LANES), jnp.float32)
            for j in range(k_tiles):
                limit = (hw - block_col0 - j * _LANES) if masked else None
                p, t = load_chunk(pl.ds(j * _LANES, _LANES), limit)
                a_tp += p * t
                a_sp += p
                a_st += t
        else:
            def body(j, carry):
                a_tp, a_sp, a_st = carry
                off = pl.multiple_of(j * _LANES, _LANES)
                limit = (hw - block_col0 - j * _LANES) if masked else None
                p, t = load_chunk(pl.ds(off, _LANES), limit)
                return (a_tp + p * t, a_sp + p, a_st + t)

            zeros = jnp.zeros((tr, _LANES), jnp.float32)
            a_tp, a_sp, a_st = lax.fori_loop(0, k_tiles, body,
                                             (zeros, zeros, zeros))

        # Lane-dense accumulator updates: full-width unmasked stores.
        tp_ref[...] += a_tp
        sp_ref[...] += a_sp
        st_ref[...] += a_st

    if need_mask or has_overhang:
        last = col_blocks - 1
        if need_mask:
            # Ragged-column masking only runs on the single edge block.
            @pl.when(block_idx == last)
            def _():
                accumulate(True)

            @pl.when(block_idx < last)
            def _():
                accumulate(False)
            # blocks with block_idx > last (split overhang) contribute nothing.
        else:
            # Odd column-block count with the 2-way split: skip the overhang.
            @pl.when(block_idx < col_blocks)
            def _():
                accumulate(False)
    else:
        accumulate(False)


@functools.partial(
    jax.jit, static_argnames=("alpha", "beta", "smooth", "max_block_bytes"))
def tversky_loss(pred, target, alpha=0.3, beta=0.7, smooth=1e-6,
                 max_block_bytes=4 << 20):
    """Exact equivalent of TverskyLoss.forward for NCHW pred/target."""
    n, c, h, w = pred.shape
    nc = n * c
    hw = h * w

    apply_sigmoid = pred.dtype != jnp.bool_
    if not apply_sigmoid:            # PyTorch skips sigmoid for bool preds.
        pred = pred.astype(jnp.float32)

    pred2 = pred.reshape(nc, hw)     # metadata-only reshape, no HBM copy
    targ2 = target.reshape(nc, hw)

    # ---- Dtype/shape-aware tiling (budget is bytes per input block). --------
    p_is = pred2.dtype.itemsize
    t_is = targ2.dtype.itemsize
    pack = max(8, 32 // min(p_is, t_is))          # sublane packing for rows
    budget_elems = max(max_block_bytes // max(p_is, t_is), pack * _LANES)

    # Rows: as many as possible while leaving room for (ideally full-width)
    # 128-aligned columns; capped so the (tr,128) accumulators stay small.
    cols_wanted = min(_round_up(hw, _LANES),
                      max(_LANES, _round_down(budget_elems // pack, _LANES)))
    tr_cap = min(2048, max(pack, _round_down(budget_elems // cols_wanted, pack)))
    tr = nc if nc <= pack else min(_round_down(nc, pack), tr_cap)
    row_blocks = _cdiv(nc, tr)

    # Columns: largest multiple of 128 within the remaining budget (or all hw).
    max_cols = max(_LANES, _round_down(budget_elems // tr, _LANES))
    tile_hw = hw if hw <= max_cols else max_cols
    col_blocks = _cdiv(hw, tile_hw)
    need_mask = (col_blocks * tile_hw != hw)

    # 2-way spatial split (leading parallel axis) when rows give no
    # parallelism; keeps both v7x TensorCores busy, harmless on v5e/v6e.
    n_split = 2 if (row_blocks == 1 and col_blocks >= 2) else 1
    cols_per_split = _cdiv(col_blocks, n_split)
    has_overhang = n_split * cols_per_split > col_blocks

    if has_overhang:
        def in_index(s, i, k):
            # Clamp the overhang block's DMA in-bounds; the kernel skips it.
            return (i, jnp.minimum(s * cols_per_split + k, col_blocks - 1))
    else:
        def in_index(s, i, k):
            return (i, s * cols_per_split + k)

    in_spec = pl.BlockSpec((tr, tile_hw), in_index)
    out_spec = pl.BlockSpec((None, tr, _LANES), lambda s, i, k: (s, i, 0))
    out_shape = jax.ShapeDtypeStruct((n_split, nc, _LANES), jnp.float32)

    kernel = functools.partial(
        _tversky_partial_sums_kernel,
        hw=hw, tile_hw=tile_hw, cols_per_split=cols_per_split,
        col_blocks=col_blocks, need_mask=need_mask, has_overhang=has_overhang,
        apply_sigmoid=apply_sigmoid)

    # VMEM limit derived from the actual pipeline footprint (+ headroom),
    # kept under v7x's 64 MiB per TensorCore.
    in_bytes = 2 * tr * tile_hw * (p_is + t_is)        # double-buffered inputs
    out_bytes = 3 * 2 * tr * _LANES * 4                # double-buffered accums
    tmp_bytes = 4 * tr * tile_hw * 4                   # in-kernel f32 temps
    vmem_limit = int(min(max(in_bytes + out_bytes + tmp_bytes + (2 << 20),
                             16 << 20), 64 << 20))

    tp3, sp3, st3 = pl.pallas_call(
        kernel,
        out_shape=(out_shape, out_shape, out_shape),
        grid_spec=pltpu.PrefetchScalarGridSpec(
            num_scalar_prefetch=0,
            grid=(n_split, row_blocks, cols_per_split),
            in_specs=[in_spec, in_spec],
            out_specs=[out_spec, out_spec, out_spec],
        ),
        compiler_params=pltpu.CompilerParams(
            # TODO(synk): switch the split axis to pltpu.CORE_PARALLEL for a
            # guaranteed 2-TensorCore shard on v7x once the target gen is known.
            dimension_semantics=("parallel", "parallel", "arbitrary"),
            vmem_limit_bytes=vmem_limit),
    )(pred2, targ2)

    # Tiny glue: fold lane partials + split halves, derive fp/fn, Tversky, mean.
    tp = jnp.sum(tp3, axis=(0, 2))
    sp = jnp.sum(sp3, axis=(0, 2))
    st = jnp.sum(st3, axis=(0, 2))
    fp = sp - tp
    fn = st - tp
    tversky = (tp + smooth) / (tp + alpha * fp + beta * fn + smooth)
    return 1.0 - jnp.mean(tversky)


def _reference(pred, target, alpha=0.3, beta=0.7, smooth=1e-6):
    p = pred.astype(jnp.float32)
    if pred.dtype != jnp.bool_:
        p = jax.nn.sigmoid(p)
    t = target.astype(jnp.float32)
    tp = jnp.sum(p * t, axis=(2, 3))
    fp = jnp.sum(p * (1 - t), axis=(2, 3))
    fn = jnp.sum((1 - p) * t, axis=(2, 3))
    tversky = (tp + smooth) / (tp + alpha * fp + beta * fn + smooth)
    return 1.0 - jnp.mean(tversky)


if __name__ == "__main__":
    key = jax.random.PRNGKey(0)

    cases = [
        # (shape, kwargs, pred dtype)
        ((2, 4, 16, 16), {}, jnp.float32),                         # main case
        ((2, 3, 17, 19), {}, jnp.float32),                         # non-128-aligned block
        ((2, 4, 16, 30), {"max_block_bytes": 4096}, jnp.float32),  # col tiling + mask + even split
        ((3, 5, 16, 16), {}, jnp.float32),                         # ragged row blocks
        ((1, 1, 42, 50), {"max_block_bytes": 4096}, jnp.float32),  # odd col blocks: overhang skip + mask
        ((1, 8, 64, 64), {"max_block_bytes": 65536}, jnp.float32), # many col tiles -> fori_loop path
        ((2, 4, 16, 16), {}, jnp.bfloat16),                        # dtype-aware tiling
    ]

    for idx, (shape, kw, pdt) in enumerate(cases):
        k1, k2 = jax.random.split(jax.random.fold_in(key, idx))
        pred = jax.random.normal(k1, shape, dtype=jnp.float32).astype(pdt)
        target = (jax.random.uniform(k2, shape) > 0.5).astype(jnp.float32)

        loss = jax.block_until_ready(tversky_loss(pred, target, **kw))
        ref = _reference(pred, target)
        assert jnp.allclose(loss, ref, atol=1e-5, rtol=1e-5), (shape, pdt, loss, ref)

    print("KERNEL_OK")
</pallas_src>

<mosaic_0001>
module attributes {stable_mosaic.version = 11 : i64} {
  func.func @_tversky_partial_sums_kernel(%arg0: i32, %arg1: i32, %arg2: i32, %arg3: memref<8x256xf32, #tpu.memory_space<vmem>>, %arg4: memref<8x256xf32, #tpu.memory_space<vmem>>, %arg5: memref<1x8x128xf32, #tpu.memory_space<vmem>>, %arg6: memref<1x8x128xf32, #tpu.memory_space<vmem>>, %arg7: memref<1x8x128xf32, #tpu.memory_space<vmem>>) attributes {dimension_semantics = [#tpu.dimension_semantics<parallel>, #tpu.dimension_semantics<parallel>, #tpu.dimension_semantics<arbitrary>], iteration_bounds = array<i64: 1, 1, 1>, scalar_prefetch = 0 : i64, scratch_operands = 0 : i64, tpu.core_type = #tpu.core_type<tc>, window_params = [{transform_indices = @transform_0, window_bounds = array<i64: 8, 256>}, {transform_indices = @transform_1, window_bounds = array<i64: 8, 256>}, {transform_indices = @transform_2, window_bounds = array<i64: 1, 8, 128>}, {transform_indices = @transform_3, window_bounds = array<i64: 1, 8, 128>}, {transform_indices = @transform_4, window_bounds = array<i64: 1, 8, 128>}]} {
    %c0_i32 = arith.constant 0 : i32
    %0 = arith.cmpi eq, %arg2, %c0_i32 : i32
    %1 = arith.extui %0 : i1 to i32
    %c0_i32_0 = arith.constant 0 : i32
    %2 = arith.cmpi ne, %1, %c0_i32_0 : i32
    scf.if %2 {
      %cst_33 = arith.constant 0.000000e+00 : f32
      %50 = vector.broadcast %cst_33 : f32 to vector<8x128xf32>
      %c0_34 = arith.constant 0 : index
      %c0_35 = arith.constant 0 : index
      %c0_36 = arith.constant 0 : index
      %51 = vector.load %arg5[%c0_34, %c0_35, %c0_36] : memref<1x8x128xf32, #tpu.memory_space<vmem>>, vector<1x8x128xf32>
      %52 = vector.shape_cast %51 : vector<1x8x128xf32> to vector<8x128xf32>
      %53 = vector.shape_cast %50 : vector<8x128xf32> to vector<1x8x128xf32>
      tpu.vector_store %arg5[%c0_34, %c0_35, %c0_36], %53 {strides = array<i32>} : memref<1x8x128xf32, #tpu.memory_space<vmem>>, vector<1x8x128xf32>,
      %c0_37 = arith.constant 0 : index
      %c0_38 = arith.constant 0 : index
      %c0_39 = arith.constant 0 : index
      %54 = vector.load %arg6[%c0_37, %c0_38, %c0_39] : memref<1x8x128xf32, #tpu.memory_space<vmem>>, vector<1x8x128xf32>
      %55 = vector.shape_cast %54 : vector<1x8x128xf32> to vector<8x128xf32>
      %56 = vector.shape_cast %50 : vector<8x128xf32> to vector<1x8x128xf32>
      tpu.vector_store %arg6[%c0_37, %c0_38, %c0_39], %56 {strides = array<i32>} : memref<1x8x128xf32, #tpu.memory_space<vmem>>, vector<1x8x128xf32>,
      %c0_40 = arith.constant 0 : index
      %c0_41 = arith.constant 0 : index
      %c0_42 = arith.constant 0 : index
      %57 = vector.load %arg7[%c0_40, %c0_41, %c0_42] : memref<1x8x128xf32, #tpu.memory_space<vmem>>, vector<1x8x128xf32>
      %58 = vector.shape_cast %57 : vector<1x8x128xf32> to vector<8x128xf32>
      %59 = vector.shape_cast %50 : vector<8x128xf32> to vector<1x8x128xf32>
      tpu.vector_store %arg7[%c0_40, %c0_41, %c0_42], %59 {strides = array<i32>} : memref<1x8x128xf32, #tpu.memory_space<vmem>>, vector<1x8x128xf32>,
    } else {
    }
    %cst = arith.constant 0.000000e+00 : f32
    %3 = vector.broadcast %cst : f32 to vector<8x128xf32>
    %cst_1 = arith.constant 0.000000e+00 : f32
    %4 = vector.broadcast %cst_1 : f32 to vector<8x128xf32>
    %cst_2 = arith.constant 0.000000e+00 : f32
    %5 = vector.broadcast %cst_2 : f32 to vector<8x128xf32>
    %c0 = arith.constant 0 : index
    %c0_3 = arith.constant 0 : index
    %6 = vector.load %arg3[%c0, %c0_3] : memref<8x256xf32, #tpu.memory_space<vmem>>, vector<8x128xf32>
    %cst_4 = arith.constant 5.000000e-01 : f32
    %7 = vector.broadcast %cst_4 : f32 to vector<8x128xf32>
    %8 = arith.mulf %7, %6 : vector<8x128xf32>
    %9 = math.tanh %8 : vector<8x128xf32>
    %cst_5 = arith.constant 5.000000e-01 : f32
    %10 = vector.broadcast %cst_5 : f32 to vector<8x128xf32>
    %11 = arith.mulf %10, %9 : vector<8x128xf32>
    %cst_6 = arith.constant 5.000000e-01 : f32
    %12 = vector.broadcast %cst_6 : f32 to vector<8x128xf32>
    %13 = arith.addf %11, %12 : vector<8x128xf32>
    %c0_7 = arith.constant 0 : index
    %c0_8 = arith.constant 0 : index
    %14 = vector.load %arg4[%c0_7, %c0_8] : memref<8x256xf32, #tpu.memory_space<vmem>>, vector<8x128xf32>
    %15 = arith.mulf %13, %14 : vector<8x128xf32>
    %16 = arith.addf %3, %15 : vector<8x128xf32>
    %17 = arith.addf %4, %13 : vector<8x128xf32>
    %18 = arith.addf %5, %14 : vector<8x128xf32>
    %c0_9 = arith.constant 0 : index
    %c128 = arith.constant 128 : index
    %19 = vector.load %arg3[%c0_9, %c128] : memref<8x256xf32, #tpu.memory_space<vmem>>, vector<8x128xf32>
    %cst_10 = arith.constant 5.000000e-01 : f32
    %20 = vector.broadcast %cst_10 : f32 to vector<8x128xf32>
    %21 = arith.mulf %20, %19 : vector<8x128xf32>
    %22 = math.tanh %21 : vector<8x128xf32>
    %cst_11 = arith.constant 5.000000e-01 : f32
    %23 = vector.broadcast %cst_11 : f32 to vector<8x128xf32>
    %24 = arith.mulf %23, %22 : vector<8x128xf32>
    %cst_12 = arith.constant 5.000000e-01 : f32
    %25 = vector.broadcast %cst_12 : f32 to vector<8x128xf32>
    %26 = arith.addf %24, %25 : vector<8x128xf32>
    %c0_13 = arith.constant 0 : index
    %c128_14 = arith.constant 128 : index
    %27 = vector.load %arg4[%c0_13, %c128_14] : memref<8x256xf32, #tpu.memory_space<vmem>>, vector<8x128xf32>
    %28 = arith.mulf %26, %27 : vector<8x128xf32>
    %29 = arith.addf %16, %28 : vector<8x128xf32>
    %30 = arith.addf %17, %26 : vector<8x128xf32>
    %31 = arith.addf %18, %27 : vector<8x128xf32>
    %c0_15 = arith.constant 0 : index
    %c0_16 = arith.constant 0 : index
    %c0_17 = arith.constant 0 : index
    %32 = vector.load %arg5[%c0_15, %c0_16, %c0_17] : memref<1x8x128xf32, #tpu.memory_space<vmem>>, vector<1x8x128xf32>
    %33 = vector.shape_cast %32 : vector<1x8x128xf32> to vector<8x128xf32>
    %34 = arith.addf %33, %29 : vector<8x128xf32>
    %c0_18 = arith.constant 0 : index
    %c0_19 = arith.constant 0 : index
    %c0_20 = arith.constant 0 : index
    %35 = vector.load %arg5[%c0_18, %c0_19, %c0_20] : memref<1x8x128xf32, #tpu.memory_space<vmem>>, vector<1x8x128xf32>
    %36 = vector.shape_cast %35 : vector<1x8x128xf32> to vector<8x128xf32>
    %37 = vector.shape_cast %34 : vector<8x128xf32> to vector<1x8x128xf32>
    tpu.vector_store %arg5[%c0_18, %c0_19, %c0_20], %37 {strides = array<i32>} : memref<1x8x128xf32, #tpu.memory_space<vmem>>, vector<1x8x128xf32>,
    %c0_21 = arith.constant 0 : index
    %c0_22 = arith.constant 0 : index
    %c0_23 = arith.constant 0 : index
    %38 = vector.load %arg6[%c0_21, %c0_22, %c0_23] : memref<1x8x128xf32, #tpu.memory_space<vmem>>, vector<1x8x128xf32>
    %39 = vector.shape_cast %38 : vector<1x8x128xf32> to vector<8x128xf32>
    %40 = arith.addf %39, %30 : vector<8x128xf32>
    %c0_24 = arith.constant 0 : index
    %c0_25 = arith.constant 0 : index
    %c0_26 = arith.constant 0 : index
    %41 = vector.load %arg6[%c0_24, %c0_25, %c0_26] : memref<1x8x128xf32, #tpu.memory_space<vmem>>, vector<1x8x128xf32>
    %42 = vector.shape_cast %41 : vector<1x8x128xf32> to vector<8x128xf32>
    %43 = vector.shape_cast %40 : vector<8x128xf32> to vector<1x8x128xf32>
    tpu.vector_store %arg6[%c0_24, %c0_25, %c0_26], %43 {strides = array<i32>} : memref<1x8x128xf32, #tpu.memory_space<vmem>>, vector<1x8x128xf32>,
    %c0_27 = arith.constant 0 : index
    %c0_28 = arith.constant 0 : index
    %c0_29 = arith.constant 0 : index
    %44 = vector.load %arg7[%c0_27, %c0_28, %c0_29] : memref<1x8x128xf32, #tpu.memory_space<vmem>>, vector<1x8x128xf32>
    %45 = vector.shape_cast %44 : vector<1x8x128xf32> to vector<8x128xf32>
    %46 = arith.addf %45, %31 : vector<8x128xf32>
    %c0_30 = arith.constant 0 : index
    %c0_31 = arith.constant 0 : index
    %c0_32 = arith.constant 0 : index
    %47 = vector.load %arg7[%c0_30, %c0_31, %c0_32] : memref<1x8x128xf32, #tpu.memory_space<vmem>>, vector<1x8x128xf32>
    %48 = vector.shape_cast %47 : vector<1x8x128xf32> to vector<8x128xf32>
    %49 = vector.shape_cast %46 : vector<8x128xf32> to vector<1x8x128xf32>
    tpu.vector_store %arg7[%c0_30, %c0_31, %c0_32], %49 {strides = array<i32>} : memref<1x8x128xf32, #tpu.memory_space<vmem>>, vector<1x8x128xf32>,
    return
  }
  func.func @transform_0(%arg0: i32, %arg1: i32, %arg2: i32) -> (i32, i32) {
    %c1_i32 = arith.constant 1 : i32
    %0 = arith.muli %arg0, %c1_i32 : i32
    %1 = arith.addi %0, %arg2 : i32
    %c0_i32 = arith.constant 0 : i32
    return %arg1, %1 : i32, i32
  }
  func.func @transform_1(%arg0: i32, %arg1: i32, %arg2: i32) -> (i32, i32) {
    %c1_i32 = arith.constant 1 : i32
    %0 = arith.muli %arg0, %c1_i32 : i32
    %1 = arith.addi %0, %arg2 : i32
    %c0_i32 = arith.constant 0 : i32
    return %arg1, %1 : i32, i32
  }
  func.func @transform_2(%arg0: i32, %arg1: i32, %arg2: i32) -> (i32, i32, i32) {
    %c0_i32 = arith.constant 0 : i32
    %c0_i32_0 = arith.constant 0 : i32
    return %arg0, %arg1, %c0_i32 : i32, i32, i32
  }
  func.func @transform_3(%arg0: i32, %arg1: i32, %arg2: i32) -> (i32, i32, i32) {
    %c0_i32 = arith.constant 0 : i32
    %c0_i32_0 = arith.constant 0 : i32
    return %arg0, %arg1, %c0_i32 : i32, i32, i32
  }
  func.func @transform_4(%arg0: i32, %arg1: i32, %arg2: i32) -> (i32, i32, i32) {
    %c0_i32 = arith.constant 0 : i32
    %c0_i32_0 = arith.constant 0 : i32
    return %arg0, %arg1, %c0_i32 : i32, i32, i32
  }
}

</mosaic_0001>

<bundles_post_ra>
// kernel: tversky_loss.1
= control target key start
LH: loop header
LB: loop body
LE: loop exit
PB: predicated region body
PF: predicated region fallthrough
CT: control target
= control target key end

     0   :  { %s169_s0 = inlined_call_operand.vmem [shape: f32[8,256], index: 0, kind: input, shape index: {}]   ;;  %s170_s1 = inlined_call_operand.vmem [shape: f32[8,256], index: 1, kind: input, shape index: {}]   ;;  %s171_s4 = inlined_call_operand.vmem [shape: f32[1,8,128], index: 4, kind: output, shape index: {2}]   ;;  %s172_s3 = inlined_call_operand.vmem [shape: f32[1,8,128], index: 3, kind: output, shape index: {1}]   ;;  %s173_s2 = inlined_call_operand.vmem [shape: f32[1,8,128], index: 2, kind: output, shape index: {0}]  }
   0x1   :  { %v65_v0 = vld [vmem:[%s169_s0] sm:$0xff]  ;;  %v75_v1 = vld [vmem:[%s169_s0 + $0x8] sm:$0xff] }
   0x2   :  { %v66_v2 = vmul.f32 0.5, %v65_v0  ;;  %v70_v3 = vld [vmem:[%s170_s1] sm:$0xff]  ;;  %v76_v4 = vmul.f32 0.5, %v75_v1  ;;  %v80_v5 = vld [vmem:[%s170_s1 + $0x8] sm:$0xff] }
   0x3   :  { %v84_v6 = vadd.f32 %v80_v5, %v70_v3 }
   0x4   :  { %119 = vtanh.f32 %v66_v2 }
   0x5   :  { %121 = vtanh.f32 %v76_v4  ;;  %93 = vst [vmem:[%s171_s4] sm:$0xff] %v84_v6 }
  0x11   :  { %v120_v7 = vpop.eup %119 }
  0x12   :  { %v122_v8 = vpop.eup %121  ;;  %v68_v9 = vmul.f32 0.5, %v120_v7 }
  0x13   :  { %v78_v10 = vmul.f32 0.5, %v122_v8 }
  0x14   :  { %v69_v11 = vadd.f32 0.5, %v68_v9 }
  0x15   :  { %v79_v12 = vadd.f32 0.5, %v78_v10 }
  0x16   :  { %v71_v13 = vmul.f32 %v70_v3, %v69_v11 }
  0x17   :  { %v81_v14 = vmul.f32 %v80_v5, %v79_v12  ;;  %v83_v15 = vadd.f32 %v79_v12, %v69_v11 }
  0x19   :  { %v82_v16 = vadd.f32 %v81_v14, %v71_v13  ;;  %90 = vst [vmem:[%s172_s3] sm:$0xff] %v83_v15 }
  0x1b   :  { %87 = vst [vmem:[%s173_s2] sm:$0xff] %v82_v16 }

</bundles_post_ra>
